<compile_context>
chip_gen: v7x
topology: tpu7x:2x2x1
jax: 0.10.0
libtpu: 0.0.40
codegen_flags: <defaults>
</compile_context>

<pallas_src>
import jax
import jax.numpy as jnp
from jax.experimental import pallas as pl
from jax.experimental.pallas import tpu as pltpu


_DEFAULT_TILE_M = 2048       # rows of the (rows, 128) lane-dense view per grid step
_SMALL_N_FALLBACK = 65536    # below this many batch rows, plain jnp is cheaper


def _het_spindly_kernel(c_ref, x_ref, o_ref):
    """c_ref: VMEM (2, 128) f32, resident across all grid steps:
         row 0 = per-lane weight  (w1 in even lanes, w2 in odd lanes)
         row 1 = column-0 indicator (1.0 in even lanes, 0.0 in odd lanes)
       x_ref / o_ref: VMEM (tm, 128) blocks in the input's native dtype.
    """
    x = x_ref[...].astype(jnp.float32)          # cast in-register, not in HBM
    w_row = c_ref[0:1, :]                       # (1, 128) f32, already resident
    is_col0 = c_ref[1:2, :] != 0.0              # one cheap vcmp per grid step
    y = x * w_row
    # exp is evaluated on all 128 lanes; even-lane results (possibly inf/NaN for
    # large w1*x) are discarded by the select.  This is benign on TPU: no FP
    # traps, and jnp.where does not propagate the unselected branch.  Only
    # restructure (de-interleave columns) if a v7x bundle dump shows the single
    # EUP slot saturating.
    o_ref[...] = jnp.where(is_col0, y, jnp.exp(y)).astype(o_ref.dtype)


def _jnp_forward(x, w1, w2):
    """Fused XLA fallback / reference path.  Computes in f32, returns x.dtype."""
    xf = x.astype(jnp.float32)
    out = jnp.concatenate([xf[:, 0:1] * w1, jnp.exp(xf[:, 1:2] * w2)], axis=1)
    return out.astype(x.dtype)


def _pick_tile(rows, tile_m, itemsize):
    """Row-tile for the (rows, 128) view.  Multiple of the dtype's minimum
    sublane tile; forces >=2 grid steps when possible so the ("parallel",)
    axis actually shards across both TensorCores on v7x."""
    min_t = 8 if itemsize >= 4 else (16 if itemsize == 2 else 32)
    if rows <= 2 * min_t:
        return rows                                   # single full-array block
    if rows <= tile_m:
        half = -(-rows // 2)                          # cdiv(rows, 2)
        return -(-half // min_t) * min_t              # round up to min tile
    return max(min_t, (tile_m // min_t) * min_t)


def het_spindly_head(x, w1, w2, *, tile_m=_DEFAULT_TILE_M,
                     small_n_fallback=_SMALL_N_FALLBACK):
    """x: (N, 2) float array.  Returns (N, 2) in x.dtype with
       out[:, 0] = w1 * x[:, 0],  out[:, 1] = exp(w2 * x[:, 1])."""
    N, F = x.shape
    assert F == 2, "HetSpindlyHead consumes exactly two features"
    w1 = jnp.asarray(w1, jnp.float32).reshape(())
    w2 = jnp.asarray(w2, jnp.float32).reshape(())

    # Tiny batches: pallas_call launch overhead + forced materialization costs
    # more than the op; stay in plain, fusable XLA.
    if N < max(small_n_fallback, 64):
        return _jnp_forward(x, w1, w2)

    # Pallas covers the largest multiple-of-64 prefix (so the contiguous (n, 2)
    # buffer reshapes exactly into a lane-dense (rows, 128) view); the <=63-row
    # ragged tail takes the fused jnp path.  No pad copy, no output slice.
    n_main = (N // 64) * 64
    x_main = x if n_main == N else x[:n_main]
    rows = n_main // 64
    x_lanes = x_main.reshape(rows, 128)        # free bitcast of contiguous buffer

    tm = _pick_tile(rows, tile_m, jnp.dtype(x.dtype).itemsize)

    # Per-lane constants, built once and held resident in VMEM across the grid.
    lane = jnp.arange(128, dtype=jnp.int32)
    w_row = jnp.where(lane % 2 == 0, w1, w2).astype(jnp.float32)
    col0_row = (lane % 2 == 0).astype(jnp.float32)
    const = jnp.stack([w_row, col0_row])       # (2, 128) f32

    out_lanes = pl.pallas_call(
        _het_spindly_kernel,
        out_shape=jax.ShapeDtypeStruct((rows, 128), x.dtype),
        grid=(pl.cdiv(rows, tm),),
        in_specs=[
            pl.BlockSpec((2, 128), lambda i: (0, 0)),    # resident constants
            pl.BlockSpec((tm, 128), lambda i: (i, 0)),
        ],
        out_specs=pl.BlockSpec((tm, 128), lambda i: (i, 0)),
        compiler_params=pltpu.CompilerParams(
            dimension_semantics=("parallel",),  # megacore sharding on v7x
        ),
    )(const, x_lanes)

    out_main = out_lanes.reshape(n_main, 2)
    if n_main == N:
        return out_main
    out_tail = _jnp_forward(x[n_main:], w1, w2)
    return jnp.concatenate([out_main, out_tail], axis=0)


if __name__ == "__main__":
    key = jax.random.PRNGKey(0)
    k_x1, k_x2, k_x3, k_w = jax.random.split(key, 4)

    # Parameter init mirroring the PyTorch module: lin1.weight is a random
    # scalar, lin2.weight is explicitly zero-filled.
    w1 = jax.random.uniform(k_w, (), dtype=jnp.float32, minval=-1.0, maxval=1.0)
    w2 = jnp.float32(0.0)

    # 1) Main Pallas path (f32, N multiple of 64).  small_n_fallback=0 forces
    #    the kernel at this small demo size; the >=2-step grid is exercised.
    x1 = jax.random.normal(k_x1, (4096, 2), dtype=jnp.float32)
    out1 = jax.block_until_ready(het_spindly_head(x1, w1, w2, small_n_fallback=0))
    assert out1.shape == (4096, 2) and out1.dtype == jnp.float32
    assert jnp.allclose(out1, _jnp_forward(x1, w1, w2), atol=1e-5, rtol=1e-5)

    # 1b) Non-zero second weight (checks lane-parity weight mapping + exp lanes).
    w2_alt = jnp.float32(0.3)
    out1b = jax.block_until_ready(het_spindly_head(x1, w1, w2_alt, small_n_fallback=0))
    assert jnp.allclose(out1b, _jnp_forward(x1, w1, w2_alt), atol=1e-5, rtol=1e-5)

    # 2) Ragged N: Pallas on the 960-row prefix, fused jnp tail, single concat.
    x2 = jax.random.normal(k_x2, (1000, 2), dtype=jnp.float32)
    out2 = jax.block_until_ready(het_spindly_head(x2, w1, w2_alt, small_n_fallback=0))
    assert out2.shape == (1000, 2)
    assert jnp.allclose(out2, _jnp_forward(x2, w1, w2_alt), atol=1e-5, rtol=1e-5)

    # 3) Native bf16 input/output: casts happen in-register inside the kernel.
    x3 = jax.random.normal(k_x3, (4096, 2), dtype=jnp.float32).astype(jnp.bfloat16)
    out3 = jax.block_until_ready(het_spindly_head(x3, w1, w2_alt, small_n_fallback=0))
    assert out3.shape == (4096, 2) and out3.dtype == jnp.bfloat16
    ref3 = _jnp_forward(x3, w1, w2_alt)
    assert jnp.allclose(out3.astype(jnp.float32), ref3.astype(jnp.float32),
                        atol=2e-2, rtol=2e-2)

    # 4) Tiny batch: default fallback keeps it in plain, fusable XLA.
    x4 = jax.random.normal(k_x1, (8, 2), dtype=jnp.float32)
    out4 = jax.block_until_ready(het_spindly_head(x4, w1, w2))
    assert out4.shape == (8, 2)
    assert jnp.allclose(out4, _jnp_forward(x4, w1, w2), atol=1e-6, rtol=1e-6)

    print("KERNEL_OK")
</pallas_src>

<mosaic_0001>
module attributes {stable_mosaic.version = 11 : i64} {
  func.func @_het_spindly_kernel(%arg0: i32, %arg1: memref<2x128xf32, #tpu.memory_space<vmem>>, %arg2: memref<32x128xf32, #tpu.memory_space<vmem>>, %arg3: memref<32x128xf32, #tpu.memory_space<vmem>>) attributes {dimension_semantics = [#tpu.dimension_semantics<parallel>], iteration_bounds = array<i64: 2>, scalar_prefetch = 0 : i64, scratch_operands = 0 : i64, tpu.core_type = #tpu.core_type<tc>, window_params = [{pipeline_mode = #tpu.pipeline_mode<synchronous>, transform_indices = @transform_0, window_bounds = array<i64: 2, 128>}, {transform_indices = @transform_1, window_bounds = array<i64: 32, 128>}, {transform_indices = @transform_2, window_bounds = array<i64: 32, 128>}]} {
    %c0 = arith.constant 0 : index
    %c0_0 = arith.constant 0 : index
    %0 = vector.load %arg2[%c0, %c0_0] : memref<32x128xf32, #tpu.memory_space<vmem>>, vector<32x128xf32>
    %c0_1 = arith.constant 0 : index
    %c0_2 = arith.constant 0 : index
    %1 = vector.load %arg1[%c0_1, %c0_2] : memref<2x128xf32, #tpu.memory_space<vmem>>, vector<1x128xf32>
    %c1 = arith.constant 1 : index
    %c0_3 = arith.constant 0 : index
    %2 = vector.load %arg1[%c1, %c0_3] : memref<2x128xf32, #tpu.memory_space<vmem>>, vector<1x128xf32>
    %cst = arith.constant 0.000000e+00 : f32
    %3 = vector.broadcast %cst : f32 to vector<1x128xf32>
    %4 = arith.cmpf one, %2, %3 : vector<1x128xf32>
    %5 = vector.broadcast %1 : vector<1x128xf32> to vector<32x128xf32>
    %6 = arith.mulf %0, %5 : vector<32x128xf32>
    %7 = math.exp %6 : vector<32x128xf32>
    %8 = vector.shape_cast %4 : vector<1x128xi1> to vector<1x128xi1>
    %9 = vector.broadcast %8 : vector<1x128xi1> to vector<32x128xi1>
    %10 = arith.select %9, %6, %7 : vector<32x128xi1>, vector<32x128xf32>
    %c0_4 = arith.constant 0 : index
    %c0_5 = arith.constant 0 : index
    %11 = vector.load %arg3[%c0_4, %c0_5] : memref<32x128xf32, #tpu.memory_space<vmem>>, vector<32x128xf32>
    tpu.vector_store %arg3[%c0_4, %c0_5], %10 {strides = array<i32>} : memref<32x128xf32, #tpu.memory_space<vmem>>, vector<32x128xf32>,
    return
  }
  func.func @transform_0(%arg0: i32) -> (i32, i32) {
    %c0_i32 = arith.constant 0 : i32
    %c0_i32_0 = arith.constant 0 : i32
    %c0_i32_1 = arith.constant 0 : i32
    return %c0_i32, %c0_i32_0 : i32, i32
  }
  func.func @transform_1(%arg0: i32) -> (i32, i32) {
    %c0_i32 = arith.constant 0 : i32
    %c0_i32_0 = arith.constant 0 : i32
    return %arg0, %c0_i32 : i32, i32
  }
  func.func @transform_2(%arg0: i32) -> (i32, i32) {
    %c0_i32 = arith.constant 0 : i32
    %c0_i32_0 = arith.constant 0 : i32
    return %arg0, %c0_i32 : i32, i32
  }
}

</mosaic_0001>

<bundles_post_ra>
// kernel: tpu_custom_call.1
= control target key start
LH: loop header
LB: loop body
LE: loop exit
PB: predicated region body
PF: predicated region fallthrough
CT: control target
= control target key end

     0   :  { %7 = vsyncpa [#allocation3], 0  ;;  %s761_s0 = inlined_call_operand.hbm [shape: f32[2,128], index: 0, kind: input, shape index: {}]   ;;  %s762_s1 = inlined_call_operand.hbm [shape: f32[64,128], index: 1, kind: input, shape index: {}]   ;;  %s763_s2 = inlined_call_operand.hbm [shape: f32[64,128], index: 2, kind: output, shape index: {}]  }
   0x1   :  { %8 = vsyncpa [#allocation6], 0 }
   0x2   :  { %10 = vsyncpa [#allocation6 + $0x1], 0 }
   0x3   :  { %11 = vsyncpa [#allocation4], 0 }
   0x4   :  { %13 = vsyncpa [#allocation4 + $0x1], 0  ;;  %s555_s9 = smov 0   ;;  %s557_s10 = smov 0  }
   0x5   :  { %s559_s11 = smov 0   ;;  %s561_s12 = smov 0  }
   0x6 LB: > { %s576_s13 = sadd.s32 4294967295, %s530_s12   ;;  %s313_s14 = sadd.s32 4294967294, %s530_s12   ;;  %s530_s12 = sphi %s561_s12, %s788_s12   ;;  %s526_s11 = sphi %s559_s11, %s787_s11   ;;  %s522_s10 = sphi %s557_s10, %s786_s10   ;;  %s518_s9 = sphi %s555_s9, %s785_s9  }
   0x7   : > { %s580_s15 = sadd.s32 1, %s530_s12   ;;  %s47_s16 = sadd.s32 1, %s526_s11 }
   0x8   : > { %s44_s17 = ssub.s32 %s530_s12, %s580_s15  ;;  %p54_p0 = scmp.ne.s32.totalorder %s526_s11, %s522_s10 }
   0x9   : > { %p45_p1 = scmp.eq.s32.totalorder %s44_s17, 0  ;;  %p55_p2 = scmp.eq.s32.totalorder %s530_s12, 0 }
   0xa   : > { %p60_p3 = scmp.ne.s32.totalorder %s522_s10, %s518_s9  ;;  %p764_p4 = scmp.eq.s32.totalorder %s576_s13, 0 }
   0xb   : > { %s592_s18 = scalar_select %p45_p1, %s526_s11, %s47_s16  }
   0xc   : > { %p594_p5 = por %p55_p2, %p54_p0  ;;  %p600_p6 = por %p764_p4, %p60_p3 }
   0xd   : > { %p84_p7 = scmp.eq.s32.totalorder %s576_s13, 1  ;;  %p90_p8 = scmp.eq.s32.totalorder %s313_s14, 1 }
   0xe   : > { %s770_s20 = scalar_select %p600_p6, 1, 0 }
   0xf   : > { %p314_p9 = scmp.ge.s32.totalorder %s530_s12, 1  ;;  %p97_p10 = scmp.lt.s32.totalorder %s530_s12, 3 }
  0x10   : > { %p607_p11 = por %p84_p7, %p54_p0  ;;  %p611_p12 = por %p90_p8, %p60_p3 }
  0x11   : > { %p615_p13 = pnand %p314_p9, %p97_p10  ;;  %s532_s24 = smov [#allocation2]  }
  0x12   : > { %s771_s21 = scalar_select %p607_p11, 1, 0 }
  0x13   : > { %s772_s22 = scalar_select %p611_p12, 1, 0 }
  0x14   : > { %s773_s23 = scalar_select %p615_p13, 1, 0 }
  0x15   : > { %p340_p2 = pneg %p615_p13  ;;  %s110_s25 = sshll.u32 %s532_s24, 4  ;;  %s111_s25 = int_to_ptr.vmem [resolvable:$true] %s110_s25 }
  0x16   : > { %p353_p4 = scmp.lt.s32.totalorder %s530_s12, 2  ;;  %p774_p0 = scmp.eq.s32.totalorder %s576_s13, 0 }
  0x17   : > { %s121_s27 = sand.u32 1, %s526_s11   ;;  %s402_s4 = scalar_lea.hbm %s761_s0, 32 }
  0x18   : > { %p625_p7 = pnand %p340_p2, %p774_p0  ;;  %p632_p3 = pnand %p353_p4, %p594_p5 }
  0x19   : > { %s317_s29 = sshll.u32 %s121_s27, 5  ;;  %p403_p8 = scmp.ne.s32.totalorder %s761_s0, %s402_s4 }
  0x1a   : > { %s776_s28 = scalar_select %p632_p3, 1, 0 }
  0x1b   : > { %p404_p9 = pneg %p625_p7  ;;  %p409_p4 = scmp.lt.u32.totalorder %s402_s4, %s761_s0 }
  0x1d   : > { %p405_p10 = pnand %p404_p9, %p403_p8 }
  0x1f   : > { %p406_p2 = pneg %p405_p10 }
  0x21   : > { %p411_p5 = pnand %p409_p4, %p406_p2 }
  0x23   : > { %414 = shalt.err (!%p411_p5)
}
  0x24   : > { %s415_s14 = scalar_lea.vmem %s111_s25, 32  ;;  %p423_p11 = scmp.lt.s32.totalorder %s111_s25, %s111_s25 }
  0x25   : > { %p416_p0 = scmp.ne.s32.totalorder %s111_s25, %s415_s14  ;;  %p424_p6 = scmp.lt.s32.totalorder %s415_s14, %s415_s14 }
  0x27   : > { %p418_p1 = pnand %p416_p0, %p404_p9  ;;  %p425_p13 = por %p424_p6, %p423_p11 }
  0x29   : > { %p419_p12 = pneg %p418_p1 }
  0x2b   : > { %p426_p3 = pnand %p425_p13, %p419_p12 }
  0x2d   : > { %429 = shalt.err (!%p426_p3)
}
  0x2e   : > { %343 = dma.hbm_to_vmem [thread:$0]  (!%p625_p7), %s761_s0, 32, %s111_s25, [#allocation3]  }
  0x2f   : > { %s330_s19 = sshll.u32 %s530_s12, 9  ;;  %s125_s24 = scalar_lea.vmem [#allocation5], %s317_s29 }
  0x30   : > { %s132_s30 = sshll.u32 %s125_s24, 4  ;;  %s656_s5 = scalar_lea.hbm %s762_s1, %s330_s19  ;;  %s658_s30 = int_to_ptr.vmem [resolvable:$true] %s132_s30 }
  0x31   : > { %s660_s26 = scalar_lea.sflag [#allocation6], %s121_s27  ;;  %s430_s6 = scalar_lea.hbm %s656_s5, 512 }
  0x32   : > { %p431_p6 = scmp.ne.s32.totalorder %s656_s5, %s430_s6  ;;  %p777_p11 = scmp.ne.s32.totalorder %s776_s28, 0 }
  0x33   : > { %s435_s7 = scalar_lea.hbm %s762_s1, 1024  ;;  %p436_p7 = scmp.lt.u32.totalorder %s656_s5, %s762_s1 }
  0x34   : > { %p432_p12 = pneg %p777_p11  ;;  %p437_p3 = scmp.lt.u32.totalorder %s435_s7, %s430_s6 }
  0x35   : > { %p439_p9 = scmp.lt.u32.totalorder %s430_s6, %s656_s5 }
  0x36   : > { %p433_p13 = pnand %p432_p12, %p431_p6  ;;  %p438_p8 = por %p437_p3, %p436_p7 }
  0x38   : > { %p434_p1 = pneg %p433_p13  ;;  %p440_p10 = por %p439_p9, %p438_p8 }
  0x3a   : > { %p441_p2 = pnand %p440_p10, %p434_p1 }
  0x3c   : > { %444 = shalt.err (!%p441_p2)
}
  0x3d   : > { %s445_s27 = scalar_lea.vmem %s658_s30, 512  ;;  %s533_s16 = smov [#allocation5]  }
  0x3e   : > { %p446_p4 = scmp.ne.s32.totalorder %s658_s30, %s445_s27  ;;  %s450_s17 = sshll.u32 %s533_s16, 4  ;;  %s451_s17 = int_to_ptr.vmem [resolvable:$false] %s450_s17 }
  0x3f   : > { %s452_s19 = scalar_lea.vmem %s451_s17, 1024  ;;  %p453_p6 = scmp.lt.s32.totalorder %s658_s30, %s451_s17 }
  0x40   : > { %p448_p5 = pnand %p446_p4, %p432_p12  ;;  %p454_p13 = scmp.lt.s32.totalorder %s452_s19, %s445_s27 }
  0x42   : > { %p449_p0 = pneg %p448_p5  ;;  %p455_p7 = por %p454_p13, %p453_p6 }
  0x44   : > { %p456_p3 = pnand %p455_p7, %p449_p0 }
  0x46   : > { %459 = shalt.err (!%p456_p3)
}
  0x47   : > { %s534_s24 = smov 128   ;;  %s535_s3 = smov 8  }
  0x48   : > { %347 = dma.hbm_to_vmem [thread:$0]  (!%p777_p11), %s656_s5, 512, %s658_s30, %s660_s26, %s534_s24, %s534_s24, %s535_s3  }
  0x49   : > { %p778_p12 = scmp.ne.s32.totalorder %s773_s23, 0 }
  0x4a   : > { %p779_p1 = scmp.eq.s32.totalorder (!%p778_p12), %s576_s13, 0 }
  0x4b   : > { %144 = sbr.rel (%p778_p12) target bundleno = 122 (0x7a), region = 28 }
  0x52   : > { %505 = dma.done.wait (%p779_p1), [#allocation3], 32   ;;  %p780_p8 = pmov %p779_p1 }
  0x53   : > { %s695_s4 = sand.u32 1, %s522_s10   ;;  %p781_p11 = scmp.ne.s32.totalorder %s770_s20, 0 }
  0x54   : > { %507 = vsyncadd (%p780_p8), [#allocation3], 4294967264  ;;  %s322_s6 = sshll.u32 %s695_s4, 5  ;;  %s151_s25 = scalar_lea.sflag [#allocation6], %s695_s4 }
  0x55   : > { %s154_s28 = scalar_lea.vmem [#allocation5], %s322_s6 }
  0x56   : > { %509 = dma.done.wait (%p781_p11), %s151_s25, 512  }
  0x57   : > { %511 = vsyncadd (%p781_p11), %s151_s25, 4294966784  ;;  %v201_v0 = vlaneseq  ;;  %v177_v1 = vld [vmem:[%s154_s28] sm:$0xff]  ;;  %v324_v2 = vld [vmem:[#allocation2] ss:$0 sm:$0xff]  ;;  %v536_v17 = vmov 0   ;;  %s174_s20 = scalar_lea.vmem [#allocation7], %s322_s6 }
  0x58   : > { %v182_v3 = vld [vmem:[#allocation2 + $0x1] sm:$0x1]  ;;  %v188_v4 = vmul.f32 %v324_v2, %v177_v1  ;;  %v178_v6 = vld [vmem:[%s154_s28 + $0x8] sm:$0xff]  ;;  %v179_v7 = vld [vmem:[%s154_s28 + $0x10] sm:$0xff]  ;;  %s228_s23 = sshll.u32 %s174_s20, 4  ;;  %s331_s30 = sshll.u32 %s576_s13, 9  ;;  %s709_s23 = int_to_ptr.vmem [resolvable:$true] %s228_s23 }
  0x59   : > { %v202_v5 = vshrl.u32 %v201_v0, 7  ;;  %v180_v8 = vld [vmem:[%s154_s28 + $0x18] sm:$0xff]  ;;  %v189_v9 = vmul.f32 %v324_v2, %v178_v6  ;;  %v190_v10 = vmul.f32 %v324_v2, %v179_v7  ;;  %vm183_vm0 = vcmp.ne.f32.partialorder %v182_v3, 0.0  ;;  %s715_s29 = scalar_lea.hbm %s763_s2, %s331_s30  ;;  %s215_s13 = scalar_lea.sflag [#allocation4], %s695_s4 }
  0x5a   : > { %v191_v11 = vmul.f32 %v324_v2, %v180_v8  ;;  %v192_v12 = vmul.f32 1.442695, %v188_v4  ;;  %v200_v18 = vsel %vm183_vm0, 1, %v536_v17  ;;  %s460_s7 = scalar_lea.vmem %s709_s23, 512  ;;  %p782_p10 = scmp.ne.s32.totalorder %s771_s21, 0 }
  0x5b   : > { %v194_v13 = vmul.f32 1.442695, %v189_v9  ;;  %v196_v14 = vmul.f32 1.442695, %v190_v10  ;;  %v203_v16 = vsub.s32 0, %v202_v5  ;;  %p461_p9 = scmp.ne.s32.totalorder %s709_s23, %s460_s7  ;;  %s537_s8 = smov [#allocation7]  }
  0x5c   : > { %v198_v15 = vmul.f32 1.442695, %v191_v11  ;;  %394 = vpow2.f32 %v192_v12  ;;  %s464_s14 = sshll.u32 %s537_s8, 4  ;;  %s465_s14 = int_to_ptr.vmem [resolvable:$false] %s464_s14 }
  0x5d   : > { %396 = vpow2.f32 %v194_v13  ;;  %v204_v19 = vrot.slane %v200_v18, %v203_v16  ;;  %p462_p2 = pnand %p461_p9, %p782_p10  ;;  %s466_s27 = scalar_lea.vmem %s465_s14, 1024 }
  0x5e   : > { %398 = vpow2.f32 %v196_v14  ;;  %p467_p5 = scmp.lt.s32.totalorder %s709_s23, %s465_s14  ;;  %p468_p0 = scmp.lt.s32.totalorder %s466_s27, %s460_s7 }
  0x5f   : > { %400 = vpow2.f32 %v198_v15  ;;  %vm205_vm1 = vcmp.eq.s32.totalorder %v204_v19, 1  ;;  %p463_p4 = pneg %p462_p2 }
  0x60   : > { %p469_p6 = por %p468_p0, %p467_p5 }
  0x62   : > { %p470_p13 = pnand %p469_p6, %p463_p4 }
  0x66   : > { %v395_v20 = vpop.eup %394 }
  0x67   : > { %v397_v21 = vpop.eup %396  ;;  %v206_v22 = vsel %vm205_vm1, %v188_v4, %v395_v20 }
  0x68   : > { %v399_v23 = vpop.eup %398  ;;  %210 = vst [vmem:[%s174_s20] sm:$0xff] %v206_v22  ;;  %v207_v24 = vsel %vm205_vm1, %v189_v9, %v397_v21 }
  0x69   : > { %v401_v25 = vpop.eup %400  ;;  %211 = vst [vmem:[%s174_s20 + $0x8] sm:$0xff] %v207_v24  ;;  %v208_v26 = vsel %vm205_vm1, %v190_v10, %v399_v23 }
  0x6a   : > { %212 = vst [vmem:[%s174_s20 + $0x10] sm:$0xff] %v208_v26  ;;  %v209_v27 = vsel %vm205_vm1, %v191_v11, %v401_v25 }
  0x6b   : > { %213 = vst [vmem:[%s174_s20 + $0x18] sm:$0xff] %v209_v27 }
  0x6c   : > { %473 = shalt.err (!%p470_p13)
}
  0x6d   : > { %s474_s16 = scalar_lea.hbm %s715_s29, 512  ;;  %s478_s24 = scalar_lea.hbm %s763_s2, 1024 }
  0x6e   : > { %p475_p7 = scmp.ne.s32.totalorder %s715_s29, %s474_s16  ;;  %p479_p1 = scmp.lt.u32.totalorder %s715_s29, %s763_s2 }
  0x6f   : > { %p480_p8 = scmp.lt.u32.totalorder %s478_s24, %s474_s16  ;;  %p482_p9 = scmp.lt.u32.totalorder %s474_s16, %s715_s29 }
  0x70   : > { %p476_p3 = pnand %p475_p7, %p782_p10 }
  0x71   : > { %p481_p11 = por %p480_p8, %p479_p1 }
  0x72   : > { %p477_p12 = pneg %p476_p3 }
  0x73   : > { %p483_p2 = por %p482_p9, %p481_p11 }
  0x75   : > { %p484_p4 = pnand %p483_p2, %p477_p12 }
  0x77   : > { %487 = shalt.err (!%p484_p4)
}
  0x78   : > { %s538_s25 = smov 128   ;;  %s539_s28 = smov 8  }
  0x79   : > { %338 = dma.vmem_to_hbm [thread:$0]  (%p782_p10), %s709_s23, 512, %s715_s29, %s215_s13, %s538_s25, %s538_s25, %s539_s28  }
  0x7a PF: > { %s243_s20 = sand.u32 1, %s518_s9   ;;  %p783_p5 = scmp.ne.s32.totalorder %s772_s22, 0 }
  0x7b   : > { %p784_p0 = scmp.ge.s32.totalorder %s530_s12, 2  ;;  %s244_s30 = scalar_lea.sflag [#allocation4], %s243_s20 }
  0x7d   : > { %p349_p6 = pnand %p784_p0, %p783_p5 }
  0x7f   : > { %513 = dma.done.wait (!%p349_p6), %s244_s30, 512  }
  0x80   : > { %515 = vsyncadd (!%p349_p6), %s244_s30, 4294966784  ;;  %p16_p13 = scmp.ge.s32.totalorder %s580_s15, 4   ;;  %s785_s9 = smov %s522_s10 }
  0x81   : > { %s786_s10 = smov %s526_s11  ;;  %s787_s11 = smov %s592_s18 }
  0x82   : > { %s788_s12 = smov %s580_s15  ;;  %18 = sbr.rel (!%p16_p13) target bundleno = 6 (0x6), region = 78 }
  0x89   :  { %249 = vsyncpa [#allocation3], 1 }
  0x8a   :  { %251 = vsyncpa [#allocation3 + $0x1], 1 }
  0x8b   :  { %252 = vsyncpa [#allocation6], 1 }
  0x8c   :  { %254 = vsyncpa [#allocation6 + $0x1], 1 }
  0x8d   :  { %255 = vsyncpa [#allocation4], 1 }
  0x8e   :  { %257 = vsyncpa [#allocation4 + $0x1], 1 }

</bundles_post_ra>
